<compile_context>
chip_gen: v5e
topology: v5e:2x2
jax: 0.10.0
libtpu: 0.0.40
codegen_flags: <defaults>
</compile_context>

<pallas_src>
import functools

import jax
import jax.numpy as jnp
from jax import lax
from jax.experimental import pallas as pl
from jax.experimental.pallas import tpu as pltpu

_INV_SQRT2 = 0.7071067811865476


def _layernorm(x, w, b, eps=1e-5):
    mu = jnp.mean(x, axis=-1, keepdims=True)
    xc = x - mu
    var = jnp.mean(xc * xc, axis=-1, keepdims=True)
    return xc * lax.rsqrt(var + eps) * w + b


# --------------------------- kernel 1: LN1 + Q/K/V projection ---------------------------
def qkv_kernel(scale,
               x_ref, ln1w_ref, ln1b_ref,
               wq_ref, bq_ref, wk_ref, bk_ref, wv_ref, bv_ref,
               q_ref, k_ref, v_ref):
    xf = x_ref[...].astype(jnp.float32)
    h = _layernorm(xf, ln1w_ref[...], ln1b_ref[...]).astype(jnp.bfloat16)
    q = jnp.dot(h, wq_ref[...], preferred_element_type=jnp.float32) + bq_ref[...]
    k = jnp.dot(h, wk_ref[...], preferred_element_type=jnp.float32) + bk_ref[...]
    v = jnp.dot(h, wv_ref[...], preferred_element_type=jnp.float32) + bv_ref[...]
    q_ref[...] = (q * scale).astype(jnp.bfloat16)        # fold 1/sqrt(hd) into Q once
    k_ref[...] = k.astype(jnp.bfloat16)
    v_ref[...] = v.astype(jnp.bfloat16)


# ------------------- kernel 2: attention + residual + streamed FFN ---------------------
def attn_ffn_kernel(n_heads,
                    x_ref, q_ref, k_ref, v_ref,
                    wp_ref, bp_ref, ln2w_ref, ln2b_ref,
                    w1_ref, b1_ref, w2_ref, b2_ref,
                    o_ref,
                    attn_scr, x1_scr, h2_scr, acc_scr):
    # grid = (batch, q_tile, ffn_hidden_chunk); the hidden-chunk axis is innermost/"arbitrary".
    h_step = pl.program_id(2)

    @pl.when(h_step == 0)
    def _attention_and_ln2():
        tS, D = x_ref.shape
        hd = D // n_heads
        x_t = x_ref[...].astype(jnp.float32)              # (tS, D) residual input
        q_t = q_ref[...]                                   # (tS, D) bf16, pre-scaled
        k_all = k_ref[...]                                 # (S,  D) bf16
        v_all = v_ref[...]                                 # (S,  D) bf16
        # TODO(synk): attention mask (mask=None default) and train-mode dropout not wired in.
        # TODO(synk): static per-head unroll; switch to lax.fori_loop over heads if
        #             n_heads is large and vreg spills show up in the bundle dump.
        for head in range(n_heads):
            c0 = head * hd
            qh = q_t[:, c0:c0 + hd]
            kh = k_all[:, c0:c0 + hd]
            vh = v_all[:, c0:c0 + hd]
            # contract head dims directly -> no XLU transpose of kh
            s = lax.dot_general(qh, kh, (((1,), (1,)), ((), ())),
                                preferred_element_type=jnp.float32)      # (tS, S)
            s = s - jnp.max(s, axis=-1, keepdims=True)
            p = jnp.exp(s)                                               # un-normalized
            denom = jnp.sum(p, axis=-1, keepdims=True)
            ho = jnp.dot(p.astype(jnp.bfloat16), vh,
                         preferred_element_type=jnp.float32)             # (tS, hd)
            # apply softmax denominator on the small (tS, hd) matrix, not the (tS, S) one
            ho = ho * pl.reciprocal(denom, approx=True)
            attn_scr[:, c0:c0 + hd] = ho.astype(jnp.bfloat16)
        # single K=D output projection (full MXU contraction), then residual #1
        proj = jnp.dot(attn_scr[...], wp_ref[...],
                       preferred_element_type=jnp.float32) + bp_ref[...]
        x1 = x_t + proj
        x1_scr[...] = x1
        h2_scr[...] = _layernorm(x1, ln2w_ref[...], ln2b_ref[...]).astype(jnp.bfloat16)
        acc_scr[...] = jnp.zeros_like(acc_scr)

    # ---- FFN: Linear -> exact GELU -> Linear, streamed over hidden-dim chunks ----
    ff = jnp.dot(h2_scr[...], w1_ref[...],
                 preferred_element_type=jnp.float32) + b1_ref[...]
    ff = 0.5 * ff * (1.0 + lax.erf(ff * _INV_SQRT2))       # exact (erf) GELU, as torch nn.GELU
    acc_scr[...] += jnp.dot(ff.astype(jnp.bfloat16), w2_ref[...],
                            preferred_element_type=jnp.float32)

    @pl.when(h_step == pl.num_programs(2) - 1)
    def _finalize():
        o_ref[...] = (x1_scr[...] + acc_scr[...] + b2_ref[...]).astype(o_ref.dtype)


# ----------------------------------- host-side wrapper -----------------------------------
_PARAM_ORDER = ("wq", "bq", "wk", "bk", "wv", "bv", "wp", "bp",
                "ln1w", "ln1b", "ln2w", "ln2b", "w1", "b1", "w2", "b2")
_BF16_WEIGHTS = ("wq", "wk", "wv", "wp", "w1", "w2")


def _vmem_limit_bytes():
    # ~0.8x physical VMEM per generation instead of one hardcoded constant.
    try:
        cap = getattr(pltpu.get_tpu_info(), "vmem_capacity_bytes", None)
        if cap:
            return int(cap * 0.8)
    except Exception:
        pass
    return 48 * 1024 * 1024


def _const_spec(shape, single_buffer):
    zeros = (0,) * len(shape)
    idx = lambda *_: zeros
    if single_buffer:
        try:
            # constant index_map -> double-buffering buys nothing; halve VMEM residency
            return pl.BlockSpec(shape, idx, pipeline_mode=pl.Buffered(1))
        except Exception:
            pass
    return pl.BlockSpec(shape, idx)


def _prepare_params(params):
    p = {}
    for n in _PARAM_ORDER:
        v = params[n]
        if n in _BF16_WEIGHTS:
            v = v.astype(jnp.bfloat16)       # bf16 weights in HBM -> half DMA, bf16 MXU
        p[n] = v
    return p


def _transformer_block_impl(x, params, n_heads, tile_s, tile_h, single_buffer):
    B, S, D = x.shape
    H = params["w1"].shape[1]
    assert D % n_heads == 0
    hd = D // n_heads
    if tile_s is None:
        tile_s = min(S, 256)      # 256 rows streams the 256-wide MXU on v6e/v7x
    assert S % tile_s == 0, "seq_len must be divisible by the sequence tile"
    if tile_h is None:
        tile_h = min(H, 512)      # FFN weights streamed in (D,tile_h)/(tile_h,D) chunks
    assert H % tile_h == 0, "hidden dim must be divisible by the hidden tile"
    n_st = S // tile_s
    n_ht = H // tile_h
    scale = float(hd) ** -0.5

    p = _prepare_params(params)
    vmem_limit = _vmem_limit_bytes()
    cs = lambda arr: _const_spec(arr.shape, single_buffer)

    # ---------------- prologue: LN1 + Q/K/V projection for the full sequence ----------------
    q_all, k_all, v_all = pl.pallas_call(
        functools.partial(qkv_kernel, scale),
        out_shape=[jax.ShapeDtypeStruct((B, S, D), jnp.bfloat16)] * 3,
        grid_spec=pltpu.PrefetchScalarGridSpec(
            num_scalar_prefetch=0,
            grid=(B, n_st),
            in_specs=[pl.BlockSpec((None, tile_s, D), lambda b, s: (b, s, 0)),
                      cs(p["ln1w"]), cs(p["ln1b"]),
                      cs(p["wq"]), cs(p["bq"]),
                      cs(p["wk"]), cs(p["bk"]),
                      cs(p["wv"]), cs(p["bv"])],
            out_specs=[pl.BlockSpec((None, tile_s, D), lambda b, s: (b, s, 0))] * 3,
        ),
        compiler_params=pltpu.CompilerParams(
            dimension_semantics=("parallel", "parallel"),
            vmem_limit_bytes=vmem_limit,
        ),
        cost_estimate=pl.CostEstimate(
            flops=6 * B * S * D * D,
            transcendentals=B * S,
            bytes_accessed=B * S * D * 4 + 3 * B * S * D * 2 + 6 * D * D * 2),
    )(x, p["ln1w"], p["ln1b"], p["wq"], p["bq"], p["wk"], p["bk"], p["wv"], p["bv"])

    # ---------------- main: attention + residual + FFN (hidden dim streamed) ----------------
    main_flops = B * (4 * S * S * D + 2 * S * D * D + 4 * S * D * H)
    main_trans = B * (n_heads * S * S + S * H)
    main_bytes = (B * S * D * (4 + 3 * 2 + 4)
                  + (D * D + 4 * D + 2 * D * H + H) * 2)
    out = pl.pallas_call(
        functools.partial(attn_ffn_kernel, n_heads),
        out_shape=jax.ShapeDtypeStruct((B, S, D), x.dtype),
        grid_spec=pltpu.PrefetchScalarGridSpec(
            num_scalar_prefetch=0,
            grid=(B, n_st, n_ht),
            in_specs=[pl.BlockSpec((None, tile_s, D), lambda b, q, h: (b, q, 0)),  # x tile
                      pl.BlockSpec((None, tile_s, D), lambda b, q, h: (b, q, 0)),  # q tile
                      pl.BlockSpec((None, S, D), lambda b, q, h: (b, 0, 0)),       # k (full S)
                      pl.BlockSpec((None, S, D), lambda b, q, h: (b, 0, 0)),       # v (full S)
                      cs(p["wp"]), cs(p["bp"]),
                      cs(p["ln2w"]), cs(p["ln2b"]),
                      pl.BlockSpec((D, tile_h), lambda b, q, h: (0, h)),           # w1 chunk
                      pl.BlockSpec((1, tile_h), lambda b, q, h: (0, h)),           # b1 chunk
                      pl.BlockSpec((tile_h, D), lambda b, q, h: (h, 0)),           # w2 chunk
                      cs(p["b2"])],
            out_specs=pl.BlockSpec((None, tile_s, D), lambda b, q, h: (b, q, 0)),
            scratch_shapes=[pltpu.VMEM((tile_s, D), jnp.bfloat16),   # per-head attn outputs
                            pltpu.VMEM((tile_s, D), jnp.float32),    # x1 (residual #1)
                            pltpu.VMEM((tile_s, D), jnp.bfloat16),   # LN2(x1)
                            pltpu.VMEM((tile_s, D), jnp.float32)],   # FFN accumulator
        ),
        compiler_params=pltpu.CompilerParams(
            # No cross-q-tile state (K/V are inputs) -> batch and q-tile axes are parallel
            # (megacore on v7x even at B=1); the FFN hidden-chunk axis carries the
            # accumulator scratch -> must stay "arbitrary".
            dimension_semantics=("parallel", "parallel", "arbitrary"),
            vmem_limit_bytes=vmem_limit,
        ),
        cost_estimate=pl.CostEstimate(flops=main_flops,
                                      transcendentals=main_trans,
                                      bytes_accessed=main_bytes),
    )(x, q_all, k_all, v_all,
      p["wp"], p["bp"], p["ln2w"], p["ln2b"],
      p["w1"], p["b1"], p["w2"], p["b2"])
    return out


def transformer_block(x, params, n_heads, tile_s=None, tile_h=None):
    try:
        return _transformer_block_impl(x, params, n_heads, tile_s, tile_h, True)
    except Exception:
        # Fallback for jax versions that reject single-buffered (pl.Buffered(1)) input specs.
        return _transformer_block_impl(x, params, n_heads, tile_s, tile_h, False)


# ------------------------- pure-JAX reference (for checking) -------------------------
def transformer_block_ref(x, p, n_heads):
    B, S, D = x.shape
    hd = D // n_heads
    h = _layernorm(x, p["ln1w"], p["ln1b"])
    q = h @ p["wq"] + p["bq"]
    k = h @ p["wk"] + p["bk"]
    v = h @ p["wv"] + p["bv"]
    q = q.reshape(B, S, n_heads, hd).transpose(0, 2, 1, 3)
    k = k.reshape(B, S, n_heads, hd).transpose(0, 2, 1, 3)
    v = v.reshape(B, S, n_heads, hd).transpose(0, 2, 1, 3)
    scores = jnp.einsum("bhqd,bhkd->bhqk", q, k) * (hd ** -0.5)
    w = jax.nn.softmax(scores, axis=-1)
    o = jnp.einsum("bhqk,bhkd->bhqd", w, v).transpose(0, 2, 1, 3).reshape(B, S, D)
    x1 = x + (o @ p["wp"] + p["bp"])
    h2 = _layernorm(x1, p["ln2w"], p["ln2b"])
    ff = h2 @ p["w1"] + p["b1"]
    ff = 0.5 * ff * (1.0 + lax.erf(ff * _INV_SQRT2))
    ff = ff @ p["w2"] + p["b2"]
    return x1 + ff


def init_params(key, D):
    H = 4 * D
    keys = jax.random.split(key, 8)
    s = 0.05
    p = {
        "wq": jax.random.normal(keys[0], (D, D), jnp.float32) * s,
        "bq": jax.random.normal(keys[1], (1, D), jnp.float32) * s,
        "wk": jax.random.normal(keys[2], (D, D), jnp.float32) * s,
        "bk": jax.random.normal(keys[3], (1, D), jnp.float32) * s,
        "wv": jax.random.normal(keys[4], (D, D), jnp.float32) * s,
        "bv": jax.random.normal(keys[5], (1, D), jnp.float32) * s,
        "wp": jax.random.normal(keys[6], (D, D), jnp.float32) * s,
        "bp": jax.random.normal(keys[7], (1, D), jnp.float32) * s,
        "ln1w": jnp.ones((1, D), jnp.float32),
        "ln1b": jnp.zeros((1, D), jnp.float32),
        "ln2w": jnp.ones((1, D), jnp.float32),
        "ln2b": jnp.zeros((1, D), jnp.float32),
    }
    k2 = jax.random.split(keys[0], 4)
    p["w1"] = jax.random.normal(k2[0], (D, H), jnp.float32) * s
    p["b1"] = jax.random.normal(k2[1], (1, H), jnp.float32) * s
    p["w2"] = jax.random.normal(k2[2], (H, D), jnp.float32) * s
    p["b2"] = jax.random.normal(k2[3], (1, D), jnp.float32) * s
    return p


if __name__ == "__main__":
    B, S, D, n_heads = 2, 8, 32, 4
    key = jax.random.PRNGKey(0)
    kx, kw = jax.random.split(key)
    x = jax.random.normal(kx, (B, S, D), jnp.float32)
    params = init_params(kw, D)

    out = jax.block_until_ready(transformer_block(x, params, n_heads))
    ref = transformer_block_ref(x, params, n_heads)

    assert out.shape == (B, S, D)
    # bf16 MXU inputs + approx reciprocal -> loosened (still tight) tolerance.
    err = float(jnp.max(jnp.abs(out - ref)))
    assert jnp.allclose(out, ref, atol=2e-2, rtol=2e-2), f"mismatch vs reference, max|err|={err}"
    print("KERNEL_OK")
</pallas_src>

<mosaic_0001>
module attributes {stable_mosaic.version = 11 : i64} {
  func.func @qkv_kernel(%arg0: i32, %arg1: i32, %arg2: memref<1x8x32xf32, #tpu.memory_space<vmem>>, %arg3: memref<1x32xf32, #tpu.memory_space<vmem>>, %arg4: memref<1x32xf32, #tpu.memory_space<vmem>>, %arg5: memref<32x32xbf16, #tpu.memory_space<vmem>>, %arg6: memref<1x32xf32, #tpu.memory_space<vmem>>, %arg7: memref<32x32xbf16, #tpu.memory_space<vmem>>, %arg8: memref<1x32xf32, #tpu.memory_space<vmem>>, %arg9: memref<32x32xbf16, #tpu.memory_space<vmem>>, %arg10: memref<1x32xf32, #tpu.memory_space<vmem>>, %arg11: memref<1x8x32xbf16, #tpu.memory_space<vmem>>, %arg12: memref<1x8x32xbf16, #tpu.memory_space<vmem>>, %arg13: memref<1x8x32xbf16, #tpu.memory_space<vmem>>) attributes {dimension_semantics = [#tpu.dimension_semantics<parallel>, #tpu.dimension_semantics<parallel>], iteration_bounds = array<i64: 2, 1>, scalar_prefetch = 0 : i64, scratch_operands = 0 : i64, tpu.core_type = #tpu.core_type<tc>, window_params = [{transform_indices = @transform_0, window_bounds = array<i64: 1, 8, 32>}, {pipeline_mode = #tpu.pipeline_mode<synchronous>, transform_indices = @transform_1, window_bounds = array<i64: 1, 32>}, {pipeline_mode = #tpu.pipeline_mode<synchronous>, transform_indices = @transform_2, window_bounds = array<i64: 1, 32>}, {pipeline_mode = #tpu.pipeline_mode<synchronous>, transform_indices = @transform_3, window_bounds = array<i64: 32, 32>}, {pipeline_mode = #tpu.pipeline_mode<synchronous>, transform_indices = @transform_4, window_bounds = array<i64: 1, 32>}, {pipeline_mode = #tpu.pipeline_mode<synchronous>, transform_indices = @transform_5, window_bounds = array<i64: 32, 32>}, {pipeline_mode = #tpu.pipeline_mode<synchronous>, transform_indices = @transform_6, window_bounds = array<i64: 1, 32>}, {pipeline_mode = #tpu.pipeline_mode<synchronous>, transform_indices = @transform_7, window_bounds = array<i64: 32, 32>}, {pipeline_mode = #tpu.pipeline_mode<synchronous>, transform_indices = @transform_8, window_bounds = array<i64: 1, 32>}, {transform_indices = @transform_9, window_bounds = array<i64: 1, 8, 32>}, {transform_indices = @transform_10, window_bounds = array<i64: 1, 8, 32>}, {transform_indices = @transform_11, window_bounds = array<i64: 1, 8, 32>}]} {
    %c0 = arith.constant 0 : index
    %c0_0 = arith.constant 0 : index
    %c0_1 = arith.constant 0 : index
    %0 = vector.load %arg2[%c0, %c0_0, %c0_1] : memref<1x8x32xf32, #tpu.memory_space<vmem>>, vector<1x8x32xf32>
    %1 = vector.shape_cast %0 : vector<1x8x32xf32> to vector<8x32xf32>
    %c0_2 = arith.constant 0 : index
    %c0_3 = arith.constant 0 : index
    %2 = vector.load %arg3[%c0_2, %c0_3] : memref<1x32xf32, #tpu.memory_space<vmem>>, vector<1x32xf32>
    %c0_4 = arith.constant 0 : index
    %c0_5 = arith.constant 0 : index
    %3 = vector.load %arg4[%c0_4, %c0_5] : memref<1x32xf32, #tpu.memory_space<vmem>>, vector<1x32xf32>
    %cst = arith.constant dense<0.000000e+00> : vector<8xf32>
    %4 = vector.multi_reduction <add>, %1, %cst [1] : vector<8x32xf32> to vector<8xf32>
    %5 = vector.shape_cast %4 : vector<8xf32> to vector<8x1xf32>
    %cst_6 = arith.constant 3.200000e+01 : f32
    %6 = vector.broadcast %cst_6 : f32 to vector<8x1xf32>
    %7 = arith.divf %5, %6 : vector<8x1xf32>
    %8 = vector.broadcast %7 : vector<8x1xf32> to vector<8x32xf32>
    %9 = arith.subf %1, %8 : vector<8x32xf32>
    %10 = arith.mulf %9, %9 : vector<8x32xf32>
    %cst_7 = arith.constant dense<0.000000e+00> : vector<8xf32>
    %11 = vector.multi_reduction <add>, %10, %cst_7 [1] : vector<8x32xf32> to vector<8xf32>
    %12 = vector.shape_cast %11 : vector<8xf32> to vector<8x1xf32>
    %cst_8 = arith.constant 3.200000e+01 : f32
    %13 = vector.broadcast %cst_8 : f32 to vector<8x1xf32>
    %14 = arith.divf %12, %13 : vector<8x1xf32>
    %cst_9 = arith.constant 9.99999974E-6 : f32
    %15 = vector.broadcast %cst_9 : f32 to vector<8x1xf32>
    %16 = arith.addf %14, %15 : vector<8x1xf32>
    %17 = math.rsqrt %16 : vector<8x1xf32>
    %18 = vector.broadcast %17 : vector<8x1xf32> to vector<8x32xf32>
    %19 = arith.mulf %9, %18 : vector<8x32xf32>
    %20 = vector.broadcast %2 : vector<1x32xf32> to vector<8x32xf32>
    %21 = arith.mulf %19, %20 : vector<8x32xf32>
    %22 = vector.broadcast %3 : vector<1x32xf32> to vector<8x32xf32>
    %23 = arith.addf %21, %22 : vector<8x32xf32>
    %24 = arith.truncf %23 : vector<8x32xf32> to vector<8x32xbf16>
    %c0_10 = arith.constant 0 : index
    %c0_11 = arith.constant 0 : index
    %25 = vector.load %arg5[%c0_10, %c0_11] : memref<32x32xbf16, #tpu.memory_space<vmem>>, vector<32x32xbf16>
    %cst_12 = arith.constant dense<0.000000e+00> : vector<8x32xf32>
    %26 = tpu.matmul %24, %25, %cst_12 {dimension_numbers = #tpu.dot_dimension_numbers<[1], [0], [0], [1], [0, 0, 1, 1], [], []>} : vector<8x32xbf16>, vector<32x32xbf16>, vector<8x32xf32> -> vector<8x32xf32>
    %c0_13 = arith.constant 0 : index
    %c0_14 = arith.constant 0 : index
    %27 = vector.load %arg6[%c0_13, %c0_14] : memref<1x32xf32, #tpu.memory_space<vmem>>, vector<1x32xf32>
    %28 = vector.broadcast %27 : vector<1x32xf32> to vector<8x32xf32>
    %29 = arith.addf %26, %28 : vector<8x32xf32>
    %c0_15 = arith.constant 0 : index
    %c0_16 = arith.constant 0 : index
    %30 = vector.load %arg7[%c0_15, %c0_16] : memref<32x32xbf16, #tpu.memory_space<vmem>>, vector<32x32xbf16>
    %cst_17 = arith.constant dense<0.000000e+00> : vector<8x32xf32>
    %31 = tpu.matmul %24, %30, %cst_17 {dimension_numbers = #tpu.dot_dimension_numbers<[1], [0], [0], [1], [0, 0, 1, 1], [], []>} : vector<8x32xbf16>, vector<32x32xbf16>, vector<8x32xf32> -> vector<8x32xf32>
    %c0_18 = arith.constant 0 : index
    %c0_19 = arith.constant 0 : index
    %32 = vector.load %arg8[%c0_18, %c0_19] : memref<1x32xf32, #tpu.memory_space<vmem>>, vector<1x32xf32>
    %33 = vector.broadcast %32 : vector<1x32xf32> to vector<8x32xf32>
    %34 = arith.addf %31, %33 : vector<8x32xf32>
    %c0_20 = arith.constant 0 : index
    %c0_21 = arith.constant 0 : index
    %35 = vector.load %arg9[%c0_20, %c0_21] : memref<32x32xbf16, #tpu.memory_space<vmem>>, vector<32x32xbf16>
    %cst_22 = arith.constant dense<0.000000e+00> : vector<8x32xf32>
    %36 = tpu.matmul %24, %35, %cst_22 {dimension_numbers = #tpu.dot_dimension_numbers<[1], [0], [0], [1], [0, 0, 1, 1], [], []>} : vector<8x32xbf16>, vector<32x32xbf16>, vector<8x32xf32> -> vector<8x32xf32>
    %c0_23 = arith.constant 0 : index
    %c0_24 = arith.constant 0 : index
    %37 = vector.load %arg10[%c0_23, %c0_24] : memref<1x32xf32, #tpu.memory_space<vmem>>, vector<1x32xf32>
    %38 = vector.broadcast %37 : vector<1x32xf32> to vector<8x32xf32>
    %39 = arith.addf %36, %38 : vector<8x32xf32>
    %cst_25 = arith.constant 0.353553385 : f32
    %40 = vector.broadcast %cst_25 : f32 to vector<8x32xf32>
    %41 = arith.mulf %29, %40 : vector<8x32xf32>
    %42 = arith.truncf %41 : vector<8x32xf32> to vector<8x32xbf16>
    %c0_26 = arith.constant 0 : index
    %c0_27 = arith.constant 0 : index
    %c0_28 = arith.constant 0 : index
    %43 = vector.load %arg11[%c0_26, %c0_27, %c0_28] : memref<1x8x32xbf16, #tpu.memory_space<vmem>>, vector<1x8x32xbf16>
    %44 = vector.shape_cast %43 : vector<1x8x32xbf16> to vector<8x32xbf16>
    %45 = vector.shape_cast %42 : vector<8x32xbf16> to vector<1x8x32xbf16>
    tpu.vector_store %arg11[%c0_26, %c0_27, %c0_28], %45 {strides = array<i32>} : memref<1x8x32xbf16, #tpu.memory_space<vmem>>, vector<1x8x32xbf16>,
    %46 = arith.truncf %34 : vector<8x32xf32> to vector<8x32xbf16>
    %c0_29 = arith.constant 0 : index
    %c0_30 = arith.constant 0 : index
    %c0_31 = arith.constant 0 : index
    %47 = vector.load %arg12[%c0_29, %c0_30, %c0_31] : memref<1x8x32xbf16, #tpu.memory_space<vmem>>, vector<1x8x32xbf16>
    %48 = vector.shape_cast %47 : vector<1x8x32xbf16> to vector<8x32xbf16>
    %49 = vector.shape_cast %46 : vector<8x32xbf16> to vector<1x8x32xbf16>
    tpu.vector_store %arg12[%c0_29, %c0_30, %c0_31], %49 {strides = array<i32>} : memref<1x8x32xbf16, #tpu.memory_space<vmem>>, vector<1x8x32xbf16>,
    %50 = arith.truncf %39 : vector<8x32xf32> to vector<8x32xbf16>
    %c0_32 = arith.constant 0 : index
    %c0_33 = arith.constant 0 : index
    %c0_34 = arith.constant 0 : index
    %51 = vector.load %arg13[%c0_32, %c0_33, %c0_34] : memref<1x8x32xbf16, #tpu.memory_space<vmem>>, vector<1x8x32xbf16>
    %52 = vector.shape_cast %51 : vector<1x8x32xbf16> to vector<8x32xbf16>
    %53 = vector.shape_cast %50 : vector<8x32xbf16> to vector<1x8x32xbf16>
    tpu.vector_store %arg13[%c0_32, %c0_33, %c0_34], %53 {strides = array<i32>} : memref<1x8x32xbf16, #tpu.memory_space<vmem>>, vector<1x8x32xbf16>,
    return
  }
  func.func @transform_0(%arg0: i32, %arg1: i32) -> (i32, i32, i32) {
    %c0_i32 = arith.constant 0 : i32
    %c0_i32_0 = arith.constant 0 : i32
    return %arg0, %arg1, %c0_i32 : i32, i32, i32
  }
  func.func @transform_1(%arg0: i32, %arg1: i32) -> (i32, i32) {
    %c0_i32 = arith.constant 0 : i32
    %c0_i32_0 = arith.constant 0 : i32
    %c0_i32_1 = arith.constant 0 : i32
    return %c0_i32, %c0_i32_0 : i32, i32
  }
  func.func @transform_2(%arg0: i32, %arg1: i32) -> (i32, i32) {
    %c0_i32 = arith.constant 0 : i32
    %c0_i32_0 = arith.constant 0 : i32
    %c0_i32_1 = arith.constant 0 : i32
    return %c0_i32, %c0_i32_0 : i32, i32
  }
  func.func @transform_3(%arg0: i32, %arg1: i32) -> (i32, i32) {
    %c0_i32 = arith.constant 0 : i32
    %c0_i32_0 = arith.constant 0 : i32
    %c0_i32_1 = arith.constant 0 : i32
    return %c0_i32, %c0_i32_0 : i32, i32
  }
  func.func @transform_4(%arg0: i32, %arg1: i32) -> (i32, i32) {
    %c0_i32 = arith.constant 0 : i32
    %c0_i32_0 = arith.constant 0 : i32
    %c0_i32_1 = arith.constant 0 : i32
    return %c0_i32, %c0_i32_0 : i32, i32
  }
  func.func @transform_5(%arg0: i32, %arg1: i32) -> (i32, i32) {
    %c0_i32 = arith.constant 0 : i32
    %c0_i32_0 = arith.constant 0 : i32
    %c0_i32_1 = arith.constant 0 : i32
    return %c0_i32, %c0_i32_0 : i32, i32
  }
  func.func @transform_6(%arg0: i32, %arg1: i32) -> (i32, i32) {
    %c0_i32 = arith.constant 0 : i32
    %c0_i32_0 = arith.constant 0 : i32
    %c0_i32_1 = arith.constant 0 : i32
    return %c0_i32, %c0_i32_0 : i32, i32
  }
  func.func @transform_7(%arg0: i32, %arg1: i32) -> (i32, i32) {
    %c0_i32 = arith.constant 0 : i32
    %c0_i32_0 = arith.constant 0 : i32
    %c0_i32_1 = arith.constant 0 : i32
    return %c0_i32, %c0_i32_0 : i32, i32
  }
  func.func @transform_8(%arg0: i32, %arg1: i32) -> (i32, i32) {
    %c0_i32 = arith.constant 0 : i32
    %c0_i32_0 = arith.constant 0 : i32
    %c0_i32_1 = arith.constant 0 : i32
    return %c0_i32, %c0_i32_0 : i32, i32
  }
  func.func @transform_9(%arg0: i32, %arg1: i32) -> (i32, i32, i32) {
    %c0_i32 = arith.constant 0 : i32
    %c0_i32_0 = arith.constant 0 : i32
    return %arg0, %arg1, %c0_i32 : i32, i32, i32
  }
  func.func @transform_10(%arg0: i32, %arg1: i32) -> (i32, i32, i32) {
    %c0_i32 = arith.constant 0 : i32
    %c0_i32_0 = arith.constant 0 : i32
    return %arg0, %arg1, %c0_i32 : i32, i32, i32
  }
  func.func @transform_11(%arg0: i32, %arg1: i32) -> (i32, i32, i32) {
    %c0_i32 = arith.constant 0 : i32
    %c0_i32_0 = arith.constant 0 : i32
    return %arg0, %arg1, %c0_i32 : i32, i32, i32
  }
}

module attributes {stable_mosaic.version = 11 : i64} {
  func.func @qkv_kernel(%arg0: i32, %arg1: i32, %arg2: memref<1x8x32xf32, #tpu.memory_space<vmem>>, %arg3: memref<1x32xf32, #tpu.memory_space<vmem>>, %arg4: memref<1x32xf32, #tpu.memory_space<vmem>>, %arg5: memref<32x32xbf16, #tpu.memory_space<vmem>>, %arg6: memref<1x32xf32, #tpu.memory_space<vmem>>, %arg7: memref<32x32xbf16, #tpu.memory_space<vmem>>, %arg8: memref<1x32xf32, #tpu.memory_space<vmem>>, %arg9: memref<32x32xbf16, #tpu.memory_space<vmem>>, %arg10: memref<1x32xf32, #tpu.memory_space<vmem>>, %arg11: memref<1x8x32xbf16, #tpu.memory_space<vmem>>, %arg12: memref<1x8x32xbf16, #tpu.memory_space<vmem>>, %arg13: memref<1x8x32xbf16, #tpu.memory_space<vmem>>) attributes {dimension_semantics = [#tpu.dimension_semantics<parallel>, #tpu.dimension_semantics<parallel>], iteration_bounds = array<i64: 2, 1>, scalar_prefetch = 0 : i64, scratch_operands = 0 : i64, tpu.core_type = #tpu.core_type<tc>, window_params = [{transform_indices = @transform_0, window_bounds = array<i64: 1, 8, 32>}, {pipeline_mode = #tpu.pipeline_mode<synchronous>, transform_indices = @transform_1, window_bounds = array<i64: 1, 32>}, {pipeline_mode = #tpu.pipeline_mode<synchronous>, transform_indices = @transform_2, window_bounds = array<i64: 1, 32>}, {pipeline_mode = #tpu.pipeline_mode<synchronous>, transform_indices = @transform_3, window_bounds = array<i64: 32, 32>}, {pipeline_mode = #tpu.pipeline_mode<synchronous>, transform_indices = @transform_4, window_bounds = array<i64: 1, 32>}, {pipeline_mode = #tpu.pipeline_mode<synchronous>, transform_indices = @transform_5, window_bounds = array<i64: 32, 32>}, {pipeline_mode = #tpu.pipeline_mode<synchronous>, transform_indices = @transform_6, window_bounds = array<i64: 1, 32>}, {pipeline_mode = #tpu.pipeline_mode<synchronous>, transform_indices = @transform_7, window_bounds = array<i64: 32, 32>}, {pipeline_mode = #tpu.pipeline_mode<synchronous>, transform_indices = @transform_8, window_bounds = array<i64: 1, 32>}, {transform_indices = @transform_9, window_bounds = array<i64: 1, 8, 32>}, {transform_indices = @transform_10, window_bounds = array<i64: 1, 8, 32>}, {transform_indices = @transform_11, window_bounds = array<i64: 1, 8, 32>}]} {
    %c0 = arith.constant 0 : index
    %c0_0 = arith.constant 0 : index
    %c0_1 = arith.constant 0 : index
    %0 = vector.load %arg2[%c0, %c0_0, %c0_1] : memref<1x8x32xf32, #tpu.memory_space<vmem>>, vector<1x8x32xf32>
    %1 = vector.shape_cast %0 : vector<1x8x32xf32> to vector<8x32xf32>
    %c0_2 = arith.constant 0 : index
    %c0_3 = arith.constant 0 : index
    %2 = vector.load %arg3[%c0_2, %c0_3] : memref<1x32xf32, #tpu.memory_space<vmem>>, vector<1x32xf32>
    %c0_4 = arith.constant 0 : index
    %c0_5 = arith.constant 0 : index
    %3 = vector.load %arg4[%c0_4, %c0_5] : memref<1x32xf32, #tpu.memory_space<vmem>>, vector<1x32xf32>
    %cst = arith.constant dense<0.000000e+00> : vector<8xf32>
    %4 = vector.multi_reduction <add>, %1, %cst [1] : vector<8x32xf32> to vector<8xf32>
    %5 = vector.shape_cast %4 : vector<8xf32> to vector<8x1xf32>
    %cst_6 = arith.constant 3.200000e+01 : f32
    %6 = vector.broadcast %cst_6 : f32 to vector<8x1xf32>
    %7 = arith.divf %5, %6 : vector<8x1xf32>
    %8 = vector.broadcast %7 : vector<8x1xf32> to vector<8x32xf32>
    %9 = arith.subf %1, %8 : vector<8x32xf32>
    %10 = arith.mulf %9, %9 : vector<8x32xf32>
    %cst_7 = arith.constant dense<0.000000e+00> : vector<8xf32>
    %11 = vector.multi_reduction <add>, %10, %cst_7 [1] : vector<8x32xf32> to vector<8xf32>
    %12 = vector.shape_cast %11 : vector<8xf32> to vector<8x1xf32>
    %cst_8 = arith.constant 3.200000e+01 : f32
    %13 = vector.broadcast %cst_8 : f32 to vector<8x1xf32>
    %14 = arith.divf %12, %13 : vector<8x1xf32>
    %cst_9 = arith.constant 9.99999974E-6 : f32
    %15 = vector.broadcast %cst_9 : f32 to vector<8x1xf32>
    %16 = arith.addf %14, %15 : vector<8x1xf32>
    %17 = math.rsqrt %16 : vector<8x1xf32>
    %18 = vector.broadcast %17 : vector<8x1xf32> to vector<8x32xf32>
    %19 = arith.mulf %9, %18 : vector<8x32xf32>
    %20 = vector.broadcast %2 : vector<1x32xf32> to vector<8x32xf32>
    %21 = arith.mulf %19, %20 : vector<8x32xf32>
    %22 = vector.broadcast %3 : vector<1x32xf32> to vector<8x32xf32>
    %23 = arith.addf %21, %22 : vector<8x32xf32>
    %24 = arith.truncf %23 : vector<8x32xf32> to vector<8x32xbf16>
    %c0_10 = arith.constant 0 : index
    %c0_11 = arith.constant 0 : index
    %25 = vector.load %arg5[%c0_10, %c0_11] : memref<32x32xbf16, #tpu.memory_space<vmem>>, vector<32x32xbf16>
    %cst_12 = arith.constant dense<0.000000e+00> : vector<8x32xf32>
    %26 = tpu.matmul %24, %25, %cst_12 {dimension_numbers = #tpu.dot_dimension_numbers<[1], [0], [0], [1], [0, 0, 1, 1], [], []>} : vector<8x32xbf16>, vector<32x32xbf16>, vector<8x32xf32> -> vector<8x32xf32>
    %c0_13 = arith.constant 0 : index
    %c0_14 = arith.constant 0 : index
    %27 = vector.load %arg6[%c0_13, %c0_14] : memref<1x32xf32, #tpu.memory_space<vmem>>, vector<1x32xf32>
    %28 = vector.broadcast %27 : vector<1x32xf32> to vector<8x32xf32>
    %29 = arith.addf %26, %28 : vector<8x32xf32>
    %c0_15 = arith.constant 0 : index
    %c0_16 = arith.constant 0 : index
    %30 = vector.load %arg7[%c0_15, %c0_16] : memref<32x32xbf16, #tpu.memory_space<vmem>>, vector<32x32xbf16>
    %cst_17 = arith.constant dense<0.000000e+00> : vector<8x32xf32>
    %31 = tpu.matmul %24, %30, %cst_17 {dimension_numbers = #tpu.dot_dimension_numbers<[1], [0], [0], [1], [0, 0, 1, 1], [], []>} : vector<8x32xbf16>, vector<32x32xbf16>, vector<8x32xf32> -> vector<8x32xf32>
    %c0_18 = arith.constant 0 : index
    %c0_19 = arith.constant 0 : index
    %32 = vector.load %arg8[%c0_18, %c0_19] : memref<1x32xf32, #tpu.memory_space<vmem>>, vector<1x32xf32>
    %33 = vector.broadcast %32 : vector<1x32xf32> to vector<8x32xf32>
    %34 = arith.addf %31, %33 : vector<8x32xf32>
    %c0_20 = arith.constant 0 : index
    %c0_21 = arith.constant 0 : index
    %35 = vector.load %arg9[%c0_20, %c0_21] : memref<32x32xbf16, #tpu.memory_space<vmem>>, vector<32x32xbf16>
    %cst_22 = arith.constant dense<0.000000e+00> : vector<8x32xf32>
    %36 = tpu.matmul %24, %35, %cst_22 {dimension_numbers = #tpu.dot_dimension_numbers<[1], [0], [0], [1], [0, 0, 1, 1], [], []>} : vector<8x32xbf16>, vector<32x32xbf16>, vector<8x32xf32> -> vector<8x32xf32>
    %c0_23 = arith.constant 0 : index
    %c0_24 = arith.constant 0 : index
    %37 = vector.load %arg10[%c0_23, %c0_24] : memref<1x32xf32, #tpu.memory_space<vmem>>, vector<1x32xf32>
    %38 = vector.broadcast %37 : vector<1x32xf32> to vector<8x32xf32>
    %39 = arith.addf %36, %38 : vector<8x32xf32>
    %cst_25 = arith.constant 0.353553385 : f32
    %40 = vector.broadcast %cst_25 : f32 to vector<8x32xf32>
    %41 = arith.mulf %29, %40 : vector<8x32xf32>
    %42 = arith.truncf %41 : vector<8x32xf32> to vector<8x32xbf16>
    %c0_26 = arith.constant 0 : index
    %c0_27 = arith.constant 0 : index
    %c0_28 = arith.constant 0 : index
    %43 = vector.load %arg11[%c0_26, %c0_27, %c0_28] : memref<1x8x32xbf16, #tpu.memory_space<vmem>>, vector<1x8x32xbf16>
    %44 = vector.shape_cast %43 : vector<1x8x32xbf16> to vector<8x32xbf16>
    %45 = vector.shape_cast %42 : vector<8x32xbf16> to vector<1x8x32xbf16>
    tpu.vector_store %arg11[%c0_26, %c0_27, %c0_28], %45 {strides = array<i32>} : memref<1x8x32xbf16, #tpu.memory_space<vmem>>, vector<1x8x32xbf16>,
    %46 = arith.truncf %34 : vector<8x32xf32> to vector<8x32xbf16>
    %c0_29 = arith.constant 0 : index
    %c0_30 = arith.constant 0 : index
    %c0_31 = arith.constant 0 : index
    %47 = vector.load %arg12[%c0_29, %c0_30, %c0_31] : memref<1x8x32xbf16, #tpu.memory_space<vmem>>, vector<1x8x32xbf16>
    %48 = vector.shape_cast %47 : vector<1x8x32xbf16> to vector<8x32xbf16>
    %49 = vector.shape_cast %46 : vector<8x32xbf16> to vector<1x8x32xbf16>
    tpu.vector_store %arg12[%c0_29, %c0_30, %c0_31], %49 {strides = array<i32>} : memref<1x8x32xbf16, #tpu.memory_space<vmem>>, vector<1x8x32xbf16>,
    %50 = arith.truncf %39 : vector<8x32xf32> to vector<8x32xbf16>
    %c0_32 = arith.constant 0 : index
    %c0_33 = arith.constant 0 : index
    %c0_34 = arith.constant 0 : index
    %51 = vector.load %arg13[%c0_32, %c0_33, %c0_34] : memref<1x8x32xbf16, #tpu.memory_space<vmem>>, vector<1x8x32xbf16>
    %52 = vector.shape_cast %51 : vector<1x8x32xbf16> to vector<8x32xbf16>
    %53 = vector.shape_cast %50 : vector<8x32xbf16> to vector<1x8x32xbf16>
    tpu.vector_store %arg13[%c0_32, %c0_33, %c0_34], %53 {strides = array<i32>} : memref<1x8x32xbf16, #tpu.memory_space<vmem>>, vector<1x8x32xbf16>,
    return
  }
  func.func @transform_0(%arg0: i32, %arg1: i32) -> (i32, i32, i32) {
    %c0_i32 = arith.constant 0 : i32
    %c0_i32_0 = arith.constant 0 : i32
    return %arg0, %arg1, %c0_i32 : i32, i32, i32
  }
  func.func @transform_1(%arg0: i32, %arg1: i32) -> (i32, i32) {
    %c0_i32 = arith.constant 0 : i32
    %c0_i32_0 = arith.constant 0 : i32
    %c0_i32_1 = arith.constant 0 : i32
    return %c0_i32, %c0_i32_0 : i32, i32
  }
  func.func @transform_2(%arg0: i32, %arg1: i32) -> (i32, i32) {
    %c0_i32 = arith.constant 0 : i32
    %c0_i32_0 = arith.constant 0 : i32
    %c0_i32_1 = arith.constant 0 : i32
    return %c0_i32, %c0_i32_0 : i32, i32
  }
  func.func @transform_3(%arg0: i32, %arg1: i32) -> (i32, i32) {
    %c0_i32 = arith.constant 0 : i32
    %c0_i32_0 = arith.constant 0 : i32
    %c0_i32_1 = arith.constant 0 : i32
    return %c0_i32, %c0_i32_0 : i32, i32
  }
  func.func @transform_4(%arg0: i32, %arg1: i32) -> (i32, i32) {
    %c0_i32 = arith.constant 0 : i32
    %c0_i32_0 = arith.constant 0 : i32
    %c0_i32_1 = arith.constant 0 : i32
    return %c0_i32, %c0_i32_0 : i32, i32
  }
  func.func @transform_5(%arg0: i32, %arg1: i32) -> (i32, i32) {
    %c0_i32 = arith.constant 0 : i32
    %c0_i32_0 = arith.constant 0 : i32
    %c0_i32_1 = arith.constant 0 : i32
    return %c0_i32, %c0_i32_0 : i32, i32
  }
  func.func @transform_6(%arg0: i32, %arg1: i32) -> (i32, i32) {
    %c0_i32 = arith.constant 0 : i32
    %c0_i32_0 = arith.constant 0 : i32
    %c0_i32_1 = arith.constant 0 : i32
    return %c0_i32, %c0_i32_0 : i32, i32
  }
  func.func @transform_7(%arg0: i32, %arg1: i32) -> (i32, i32) {
    %c0_i32 = arith.constant 0 : i32
    %c0_i32_0 = arith.constant 0 : i32
    %c0_i32_1 = arith.constant 0 : i32
    return %c0_i32, %c0_i32_0 : i32, i32
  }
  func.func @transform_8(%arg0: i32, %arg1: i32) -> (i32, i32) {
    %c0_i32 = arith.constant 0 : i32
    %c0_i32_0 = arith.constant 0 : i32
    %c0_i32_1 = arith.constant 0 : i32
    return %c0_i32, %c0_i32_0 : i32, i32
  }
  func.func @transform_9(%arg0: i32, %arg1: i32) -> (i32, i32, i32) {
    %c0_i32 = arith.constant 0 : i32
    %c0_i32_0 = arith.constant 0 : i32
    return %arg0, %arg1, %c0_i32 : i32, i32, i32
  }
  func.func @transform_10(%arg0: i32, %arg1: i32) -> (i32, i32, i32) {
    %c0_i32 = arith.constant 0 : i32
    %c0_i32_0 = arith.constant 0 : i32
    return %arg0, %arg1, %c0_i32 : i32, i32, i32
  }
  func.func @transform_11(%arg0: i32, %arg1: i32) -> (i32, i32, i32) {
    %c0_i32 = arith.constant 0 : i32
    %c0_i32_0 = arith.constant 0 : i32
    return %arg0, %arg1, %c0_i32 : i32, i32, i32
  }
}

</mosaic_0001>

<bundles_post_ra>
// kernel: tpu_custom_call.1
= control target key start
LH: loop header
LB: loop body
LE: loop exit
PB: predicated region body
PF: predicated region fallthrough
CT: control target
= control target key end

     0   :  { %s1706_s0 = inlined_call_operand.hbm [shape: f32[2,8,32], index: 0, kind: input, shape index: {}]   ;;  %s1707_s1 = inlined_call_operand.hbm [shape: f32[1,32], index: 1, kind: input, shape index: {}]   ;;  %s1708_s2 = inlined_call_operand.vmem [shape: f32[1,32], index: 2, kind: input, shape index: {}]   ;;  %s1709_s3 = inlined_call_operand.hbm [shape: bf16[32,32], index: 3, kind: input, shape index: {}]   ;;  %s1710_s4 = inlined_call_operand.vmem [shape: f32[1,32], index: 4, kind: input, shape index: {}]   ;;  %s1711_s5 = inlined_call_operand.hbm [shape: bf16[32,32], index: 5, kind: input, shape index: {}]   ;;  %s1712_s6 = inlined_call_operand.vmem [shape: f32[1,32], index: 6, kind: input, shape index: {}]   ;;  %s1713_s7 = inlined_call_operand.hbm [shape: bf16[32,32], index: 7, kind: input, shape index: {}]   ;;  %s1714_s8 = inlined_call_operand.vmem [shape: f32[1,32], index: 8, kind: input, shape index: {}]   ;;  %s1715_s9 = inlined_call_operand.hbm [shape: bf16[2,8,32], index: 9, kind: output, shape index: {0}]   ;;  %s1716_s10 = inlined_call_operand.hbm [shape: bf16[2,8,32], index: 10, kind: output, shape index: {1}]   ;;  %s1717_s11 = inlined_call_operand.hbm [shape: bf16[2,8,32], index: 11, kind: output, shape index: {2}]  }
   0x1   :  { %1721 = sst [smem:[#allocation22_spill]] %s1706_s0 }
   0x2   :  { %1722 = sst [smem:[#allocation23_spill]] %s1707_s1 }
   0x3   :  { %1723 = sst [smem:[#allocation24_spill]] %s1708_s2 }
   0x4   :  { %1724 = sst [smem:[#allocation25_spill]] %s1709_s3 }
   0x5   :  { %1725 = sst [smem:[#allocation26_spill]] %s1710_s4 }
   0x6   :  { %1726 = sst [smem:[#allocation27_spill]] %s1711_s5 }
   0x7   :  { %1727 = sst [smem:[#allocation28_spill]] %s1713_s7 }
   0x8   :  { %17 = vsyncpa [#allocation3], 0 }
   0x9   :  { %19 = vsyncpa [#allocation3 + $0x1], 0 }
   0xa   :  { %20 = vsyncpa [#allocation6], 0 }
   0xb   :  { %21 = vsyncpa [#allocation9], 0 }
   0xc   :  { %22 = vsyncpa [#allocation4], 0 }
   0xd   :  { %24 = vsyncpa [#allocation4 + $0x1], 0 }
   0xe   :  { %25 = vsyncpa [#allocation13], 0 }
   0xf   :  { %27 = vsyncpa [#allocation13 + $0x1], 0  ;;  %s1454_s17 = smov 0   ;;  %s1456_s18 = smov 0  }
  0x10   :  { %s1458_s19 = smov 0   ;;  %s1460_s20 = smov 0  }
  0x11   :  { %s1462_s21 = smov 0   ;;  %s1464_s22 = smov 0  }
  0x12 LB: > { %1728 = sst [smem:[#allocation20_spill]] %s1381_s21  ;;  %s1485_s23 = sadd.s32 4294967295, %s1385_s22   ;;  %s1385_s22 = sphi %s1464_s22, %s33_s22   ;;  %s1381_s21 = sphi %s1462_s21, %s1744_s21   ;;  %s1377_s20 = sphi %s1460_s20, %s1743_s20   ;;  %s1373_s19 = sphi %s1458_s19, %s1747_s19   ;;  %s1369_s18 = sphi %s1456_s18, %s1746_s18   ;;  %s1365_s17 = sphi %s1454_s17, %s1745_s17  }
  0x13   : > { %p902_p0 = scmp.ge.s32.totalorder %s1385_s22, 1  ;;  %p68_p1 = scmp.eq.s32.totalorder %s1485_s23, 0 }
  0x14   : > { %p330_p2 = scmp.lt.s32.totalorder %s1385_s22, 3  ;;  %s1729_s1 = sld [smem:[#allocation23_spill]] }
  0x15   : > { %p907_p4 = scmp.ge.s32.totalorder %s1385_s22, 2  ;;  %s1387_s28 = smov [#allocation5]  }
  0x16   : > { %p1493_p3 = pnand %p902_p0, %p330_p2  ;;  %s344_s29 = sshll.u32 %s1387_s28, 4  ;;  %s345_s29 = int_to_ptr.vmem [resolvable:$true] %s344_s29 }
  0x17   : > { %s1732_s5 = sld [smem:[#allocation27_spill]]  ;;  %s1388_s15 = smov [#allocation8]  }
  0x18   : > { %p984_p5 = pneg %p1493_p3  ;;  %s375_s16 = sshll.u32 %s1388_s15, 4  ;;  %s376_s16 = int_to_ptr.vmem [resolvable:$true] %s375_s16 }
  0x19   : > { %s1733_s3 = sld [smem:[#allocation25_spill]]  ;;  %s1390_s12 = smov 4  }
  0x1a   : > { %s342_s26 = sshll.u32 %s1729_s1, 4  ;;  %p1502_p6 = pnand %p984_p5, %p68_p1  ;;  %s343_s26 = int_to_ptr.hbm [resolvable:$true] %s342_s26 }
  0x1b   : > { %s1389_s1 = smov 64   ;;  %s1734_s7 = sld [smem:[#allocation28_spill]] }
  0x1c   : > { %987 = dma.hbm_to_vmem [thread:$0]  (!%p1502_p6), %s343_s26, 16, %s345_s29, [#allocation6]  }
  0x1d   : > { %s373_s14 = sshll.u32 %s1732_s5, 4  ;;  %s1391_s15 = smov [#allocation7]   ;;  %s374_s14 = int_to_ptr.hbm [resolvable:$true] %s373_s14 }
  0x1e   : > { %993 = dma.hbm_to_vmem [thread:$0]  (!%p1502_p6), %s374_s14, 256, %s376_s16, [#allocation9], %s1389_s1, %s1389_s1, %s1390_s12  }
  0x1f   : > { %s356_s28 = sshll.u32 %s1733_s3, 4  ;;  %s358_s24 = sshll.u32 %s1391_s15, 4  ;;  %s357_s28 = int_to_ptr.hbm [resolvable:$true] %s356_s28  ;;  %s359_s24 = int_to_ptr.vmem [resolvable:$true] %s358_s24 }
  0x20   : > { %990 = dma.hbm_to_vmem [thread:$0]  (!%p1502_p6), %s357_s28, 256, %s359_s24, [#allocation6], %s1389_s1, %s1389_s1, %s1390_s12  }
  0x21   : > { %s390_s29 = sshll.u32 %s1734_s7, 4  ;;  %s1392_s25 = smov [#allocation10]   ;;  %s391_s29 = int_to_ptr.hbm [resolvable:$true] %s390_s29 }
  0x22   : > { %s392_s3 = sshll.u32 %s1392_s25, 4  ;;  %s45_s14 = sadd.s32 1, %s1381_s21  ;;  %s393_s3 = int_to_ptr.vmem [resolvable:$true] %s392_s3 }
  0x23   : > { %996 = dma.hbm_to_vmem [thread:$0]  (!%p1502_p6), %s391_s29, 256, %s393_s3, [#allocation9], %s1389_s1, %s1389_s1, %s1390_s12  }
  0x24   : > { %s1719_s16 = sadd.s32 4294967294, %s1385_s22   ;;  %p47_p7 = scmp.ge.s32.totalorder %s45_s14, 2 }
  0x25   : > { %s54_s13 = sadd.s32 1, %s1373_s19  ;;  %p61_p8 = scmp.ne.s32.totalorder %s1373_s19, %s1369_s18 }
  0x26   : > { %s1749_s14 = smov (%p47_p7, %s45_s14), 0  ;;  %p62_p9 = scmp.eq.s32.totalorder %s1385_s22, 0 }
  0x27   : > { %1735 = sst [smem:[#allocation21_spill]] %s1749_s14  ;;  %p67_p10 = scmp.ne.s32.totalorder %s1369_s18, %s1365_s17 }
  0x28   : > { %s49_s28 = ssub.s32 %s1381_s21, %s1749_s14  ;;  %p261_p11 = scmp.eq.s32.totalorder %s1485_s23, 1 }
  0x29   : > { %p52_p12 = scmp.eq.s32.totalorder %s49_s28, 0  ;;  %p1538_p13 = por %p68_p1, %p67_p10 }
  0x2a   : > { %p1542_p0 = por %p261_p11, %p61_p8  ;;  %p267_p2 = scmp.eq.s32.totalorder %s1719_s16, 1 }
  0x2b   : > { %s1549_s3 = scalar_select %p52_p12, %s1373_s19, %s54_s13  }
  0x2c   : > { %p63_p5 = por %p62_p9, %p61_p8  ;;  %p1551_p6 = por %p267_p2, %p67_p10 }
  0x2d   : > { %s409_s26 = sand.u32 1, %s1373_s19   ;;  %s909_s29 = sshll.u32 %s1381_s21, 3 }
  0x2e   : > { %p1015_p7 = scmp.lt.s32.totalorder %s1385_s22, 2  ;;  %s908_s15 = sshll.u32 %s409_s26, 3 }
  0x2f   : > { %s1739_s0 = sld [smem:[#allocation22_spill]]  ;;  %s413_s7 = scalar_lea.vmem [#allocation2], %s908_s15 }
  0x30   : > { %s422_s14 = sshll.u32 %s413_s7, 4  ;;  %p998_p11 = pnand %p1015_p7, %p63_p5  ;;  %s423_s14 = int_to_ptr.vmem [resolvable:$true] %s422_s14 }
  0x31   : > { %s410_s13 = scalar_lea.sflag [#allocation3], %s409_s26  ;;  %s1564_s16 = sand.u32 (!%p1493_p3), 1, %s1369_s18  }
  0x32   : > { %s911_s21 = sshll.u32 (!%p1493_p3), %s1564_s16, 3  ;;  %s434_s24 = scalar_lea.sflag (!%p1493_p3), [#allocation3], %s1564_s16 }
  0x33   : > { %431 = sbr.rel (%p1493_p3) target bundleno = 491 (0x1eb), region = 56 }
  0x35   : > { %s418_s28 = scalar_lea.hbm %s1739_s0, %s909_s29  ;;  %s437_s29 = scalar_lea.vmem (!%p1493_p3), [#allocation2], %s911_s21 }
  0x36   : > { %s420_s5 = sshll.u32 %s418_s28, 4  ;;  %s421_s5 = int_to_ptr.hbm [resolvable:$true] %s420_s5 }
  0x37   : > { %1000 = dma.hbm_to_vmem [thread:$0]  (!%p998_p11), %s421_s5, 128, %s423_s14, %s410_s13  }
  0x38   : > { %1344 = dma.done.wait (%p1538_p13), %s434_s24, 128  }
  0x39   : > { %1346 = vsyncadd (%p1538_p13), %s434_s24, 4294967168 }
  0x3a   : > { %1348 = dma.done.wait (%p68_p1), [#allocation6], 272  }
  0x3b   : > { %1350 = vsyncadd (%p68_p1), [#allocation6], 4294967024 }
  0x3c   : > { %1352 = dma.done.wait (%p68_p1), [#allocation9], 512  }
  0x3d   : > { %1354 = vsyncadd (%p68_p1), [#allocation9], 4294966784  ;;  %vm511_vm0 = vcmask 261120   ;;  %v508_v0 = vld [vmem:[%s437_s29] sm:$0xff]  ;;  %v1393_v2 = vmov 32.0   ;;  %v954_v17 = vld [vmem:[#allocation7] sm:$0xff] }
  0x3e   : > { %v512_v1 = vsel %vm511_vm0, %v508_v0, 0.0  ;;  %1081 = vrcp.f32 %v1393_v2  ;;  %v955_v14 = vld [vmem:[#allocation7 + $0x8] sm:$0xff]  ;;  %v957_v15 = vld [vmem:[#allocation8 + $0x8] sm:$0xff]  ;;  %v956_v18 = vld [vmem:[#allocation8] sm:$0xff]  ;;  %s1740_s2 = sld [smem:[#allocation24_spill]]  ;;  %s1589_s21 = sshll.u32 %s1564_s16, 2 }
  0x3f   : > { %513 = vadd.xlane.f32.xlu0 %v512_v1  ;;  %v959_v16 = vld [vmem:[#allocation10 + $0x8] sm:$0xff]  ;;  %579 = vmatpush.bf16.msra.mxu0 %v955_v14  ;;  %v958_v19 = vld [vmem:[#allocation10] sm:$0xff]  ;;  %v1076_v29 = vld [vmem:[#allocation5] ss:$0 sm:$0xff]  ;;  %s1592_s27 = sshll.u32 %s1377_s20, 2  ;;  %s1741_s4 = sld [smem:[#allocation26_spill]] }
  0x40   : > { %612 = vmatpush.bf16.msra.mxu1 %v957_v15  ;;  %645 = vmatpush.bf16.msra.mxu2 %v959_v16  ;;  %v1079_v37 = vld [vmem:[%s1712_s6] ss:$0 sm:$0xff]  ;;  %s697_s13 = scalar_lea.hbm %s1716_s10, %s1592_s27  ;;  %s665_s24 = sand.u32 1, %s1485_s23   ;;  %vm654_vm5 = vcmask 257024  }
  0x41   : > { %s499_s29 = scalar_lea.vmem [#allocation12], %s1589_s21  ;;  %s682_s14 = scalar_lea.hbm %s1715_s9, %s1592_s27  ;;  %v1080_v44 = vld [vmem:[%s1714_s8] ss:$0 sm:$0xff] }
  0x42   : > { %s1606_s5 = sshll.u32 %s499_s29, 4  ;;  %s1612_s30 = sshll.u32 %s697_s13, 4  ;;  %s700_s5 = int_to_ptr.vmem [resolvable:$true] %s1606_s5  ;;  %s702_s30 = int_to_ptr.hbm [resolvable:$true] %s1612_s30 }
  0x43   : > { %580 = vmatpush.bf16.msra.mxu0 %v954_v17  ;;  %s492_s26 = scalar_lea.vmem [#allocation11], %s1589_s21  ;;  %s1618_s15 = sshll.u32 %s682_s14, 4  ;;  %s687_s15 = int_to_ptr.hbm [resolvable:$true] %s1618_s15 }
  0x44   : > { %v1082_v3 = vpop.eup %1081  ;;  %613 = vmatpush.bf16.msra.mxu1 %v956_v18  ;;  %646 = vmatpush.bf16.msra.mxu2 %v958_v19  ;;  %v1077_v32 = vld [vmem:[%s1740_s2] ss:$0 sm:$0xff]  ;;  %s1616_s23 = sshll.u32 %s492_s26, 4  ;;  %s712_s7 = scalar_lea.hbm %s1717_s11, %s1592_s27  ;;  %s685_s23 = int_to_ptr.vmem [resolvable:$true] %s1616_s23 }
  0x45   : > { %v516_v4 = vmul.f32 32.0, %v1082_v3  ;;  %vm520_vm1 = vweird.f32 %v1082_v3  ;;  %v1078_v36 = vld [vmem:[%s1741_s4] ss:$0 sm:$0xff]  ;;  %s1631_s0 = scalar_lea.sflag [#allocation13], %s665_s24  ;;  %s1249_s14 = sshra.s32 %s702_s30, 4  ;;  %s1250_s14 = int_to_ptr.hbm [resolvable:$true] %s1249_s14 }
  0x46   : > { %s1251_s2 = scalar_lea.hbm %s1250_s14, 4  ;;  %s1255_s4 = scalar_lea.hbm %s1716_s10, 8 }
  0x47   : > { %v517_v5 = vsub.f32 1.0, %v516_v4  ;;  %p1252_p1 = scmp.ne.s32.totalorder %s1250_s14, %s1251_s2  ;;  %p1256_p9 = scmp.lt.s32.totalorder %s1250_s14, %s1716_s10 }
  0x48   : > { %p1257_p10 = scmp.lt.s32.totalorder %s1255_s4, %s1251_s2 }
  0x49   : > { %v518_v6 = vmul.f32 %v1082_v3, %v517_v5  ;;  %p1253_p3 = pnand %p1252_p1, %p1542_p0 }
  0x4a   : > { %p1258_p12 = por %p1257_p10, %p1256_p9 }
  0x4b   : > { %v519_v7 = vadd.f32 %v1082_v3, %v518_v6  ;;  %p1254_p8 = pneg %p1253_p3 }
  0x4d   : > { %v521_v8 = vsel %vm520_vm1, %v1082_v3, %v519_v7  ;;  %p1259_p13 = pnand %p1258_p12, %p1254_p8 }
  0xb2   : > { %v514_v9 = vpop.xlane.xlu0 %513 }
  0xb3   : > { %v522_v10 = vmul.f32 %v521_v8, %v514_v9 }
  0xb5   : > { %v523_v11 = vsub.f32 %v508_v0, %v522_v10 }
  0xb7   : > { %v524_v12 = vmul.f32 %v523_v11, %v523_v11 }
  0xb9   : > { %v525_v13 = vsel %vm511_vm0, %v524_v12, 0.0 }
  0xba   : > { %526 = vadd.xlane.f32.xlu0 %v525_v13 }
 0x12d   : > { %v527_v20 = vpop.xlane.xlu0 %526 }
 0x12e   : > { %v528_v21 = vmul.f32 %v527_v20, %v521_v8 }
 0x130   : > { %v529_v22 = vadd.f32 1e-05, %v528_v21 }
 0x132   : > { %1083 = vrsqrt.f32 %v529_v22  ;;  %vm536_vm3 = vweird.f32 %v529_v22 }
 0x138   : > { %v1084_v23 = vpop.eup %1083 }
 0x139   : > { %v531_v24 = vmul.f32 %v1084_v23, %v529_v22  ;;  %vm537_vm2 = vweird.f32 %v1084_v23 }
 0x13a   : > { %vm538_vm4 = vmor %vm536_vm3, %vm537_vm2 }
 0x13b   : > { %v532_v25 = vmul.f32 %v1084_v23, %v531_v24 }
 0x13d   : > { %v533_v26 = vmul.f32 0.5, %v532_v25 }
 0x13f   : > { %v534_v27 = vsub.f32 1.5, %v533_v26 }
 0x141   : > { %v535_v28 = vmul.f32 %v1084_v23, %v534_v27 }
 0x143   : > { %v539_v30 = vsel %vm538_vm4, %v1084_v23, %v535_v28 }
 0x144   : > { %v540_v31 = vmul.f32 %v539_v30, %v523_v11 }
 0x146   : > { %v544_v33 = vmul.f32 %v1076_v29, %v540_v31 }
 0x148   : > { %v548_v34 = vadd.f32 %v1077_v32, %v544_v33 }
 0x14a   : > { %v549_v35 = vpack.c.bf16 %v548_v34, %v548_v34 }
 0x14c   : > { %927 = vmatmul.msk.bf16.vlgmr.msra.gmra.mxu0 %vm511_vm0, %v549_v35  ;;  %936 = vmatmul.msk.bf16.vlgmr.msra.gmra.mxu1 %vm511_vm0, %v549_v35 }
 0x14d   : > { %945 = vmatmul.msk.bf16.vlgmr.msra.gmra.mxu2 %vm511_vm0, %v549_v35 }
 0x1c9   : > { %v582_v38 = vpop.f32.mrf.mxu0  ;;  %v615_v39 = vpop.f32.mrf.mxu1 }
 0x1ca   : > { %v583_v40 = vadd.f32 %v1078_v36, %v582_v38  ;;  %v616_v41 = vadd.f32 %v1079_v37, %v615_v39 }
 0x1cc   : > { %v652_v42 = vmul.f32 0.35355338, %v583_v40  ;;  %v656_v43 = vpack.c.bf16 %v616_v41, %v616_v41 }
 0x1ce   : > { %v653_v45 = vpack.c.bf16 %v652_v42, %v652_v42  ;;  %657 = vst.msk [vmem:[%s499_s29] sm:$0xf] %vm654_vm5, %v656_v43 }
 0x1cf   : > { %1262 = shalt.err (!%p1259_p13)
}
 0x1d0   : > { %979 = dma.vmem_to_hbm [thread:$0]  (%p1542_p0), %s700_s5, 64, %s702_s30, %s1631_s0   ;;  %v648_v46 = vpop.f32.mrf.mxu2  ;;  %655 = vst.msk [vmem:[%s492_s26] sm:$0xf] %vm654_vm5, %v653_v45 }
 0x1d1   : > { %s506_s24 = scalar_lea.vmem [#allocation14], %s1589_s21  ;;  %s1648_s20 = sshll.u32 %s712_s7, 4  ;;  %v649_v47 = vadd.f32 %v1080_v44, %v648_v46  ;;  %v584_v48 = vpop.f32.mrf.mxu0  ;;  %v617_v49 = vpop.f32.mrf.mxu1  ;;  %s717_s20 = int_to_ptr.hbm [resolvable:$true] %s1648_s20 }
 0x1d2   : > { %s1646_s29 = sshll.u32 %s506_s24, 4  ;;  %s661_s2 = scalar_lea.sflag [#allocation4], %s1564_s16  ;;  %s715_s29 = int_to_ptr.vmem [resolvable:$true] %s1646_s29 }
 0x1d3   : > { %s1277_s4 = sshra.s32 %s687_s15, 4  ;;  %s1283_s21 = scalar_lea.hbm %s1715_s9, 8  ;;  %s1278_s4 = int_to_ptr.hbm [resolvable:$true] %s1277_s4 }
 0x1d4   : > { %s1279_s14 = scalar_lea.hbm %s1278_s4, 4  ;;  %p1284_p11 = scmp.lt.s32.totalorder %s1278_s4, %s1715_s9 }
 0x1d5   : > { %p1280_p2 = scmp.ne.s32.totalorder %s1278_s4, %s1279_s14  ;;  %p1285_p1 = scmp.lt.s32.totalorder %s1283_s21, %s1279_s14 }
 0x1d7   : > { %p1281_p5 = pnand %p1280_p2, %p1542_p0  ;;  %p1286_p3 = por %p1285_p1, %p1284_p11 }
 0x1d9   : > { %p1282_p7 = pneg %p1281_p5 }
 0x1db   : > { %p1287_p8 = pnand %p1286_p3, %p1282_p7 }
 0x1dd   : > { %1290 = shalt.err (!%p1287_p8)
}
 0x1de   : > { %978 = dma.vmem_to_hbm [thread:$0]  (%p1542_p0), %s685_s23, 64, %s687_s15, %s661_s2   ;;  %v658_v50 = vpack.c.bf16 %v649_v47, %v649_v47 }
 0x1df   : > { %s1305_s16 = sshra.s32 %s717_s20, 4  ;;  %s1311_s27 = scalar_lea.hbm %s1717_s11, 8  ;;  %s1306_s16 = int_to_ptr.hbm [resolvable:$true] %s1305_s16 }
 0x1e0   : > { %659 = vst.msk [vmem:[%s506_s24] sm:$0xf] %vm654_vm5, %v658_v50  ;;  %s1307_s7 = scalar_lea.hbm %s1306_s16, 4  ;;  %p1312_p13 = scmp.lt.s32.totalorder %s1306_s16, %s1717_s11 }
 0x1e1   : > { %p1308_p9 = scmp.ne.s32.totalorder %s1306_s16, %s1307_s7  ;;  %p1313_p2 = scmp.lt.s32.totalorder %s1311_s27, %s1307_s7 }
 0x1e3   : > { %p1309_p10 = pnand %p1308_p9, %p1542_p0  ;;  %p1314_p5 = por %p1313_p2, %p1312_p13 }
 0x1e5   : > { %p1310_p12 = pneg %p1309_p10 }
 0x1e7   : > { %p1315_p7 = pnand %p1314_p5, %p1310_p12 }
 0x1e9   : > { %1318 = shalt.err (!%p1315_p7)
}
 0x1ea   : > { %980 = dma.vmem_to_hbm [thread:$0]  (%p1542_p0), %s715_s29, 64, %s717_s20, %s1631_s0   ;;  %v650_v51 = vpop.f32.mrf.mxu2 }
 0x1eb PF: > { %s728_s23 = sand.u32 1, %s1365_s17   ;;  %p1002_p11 = pnand %p907_p4, %p1551_p6 }
 0x1ec   : > { %s729_s15 = scalar_lea.sflag [#allocation4], %s728_s23 }
 0x1ed   : > { %p1003_p1 = pneg %p1002_p11 }
 0x1ef   : > { %1356 = dma.done.wait (%p1003_p1), %s729_s15, 64  }
 0x1f0   : > { %1358 = vsyncadd (%p1003_p1), %s729_s15, 4294967232  ;;  %s1742_s24 = sadd.s32 4294967294, %s1385_s22  }
 0x1f1   : > { %s738_s2 = sand.u32 1, %s1742_s24  }
 0x1f2   : > { %s739_s5 = scalar_lea.sflag [#allocation13], %s738_s2 }
 0x1f3   : > { %1360 = dma.done.wait (%p1003_p1), %s739_s5, 128  }
 0x1f4   : > { %1362 = vsyncadd (%p1003_p1), %s739_s5, 4294967168  ;;  %s33_s22 = sadd.s32 1, %s1385_s22   ;;  %s1743_s20 = sld [smem:[#allocation20_spill]] }
 0x1f5   : > { %p30_p0 = scmp.ge.s32.totalorder %s33_s22, 4   ;;  %s1744_s21 = sld [smem:[#allocation21_spill]] }
 0x1f6   : > { %s1745_s17 = smov %s1369_s18  ;;  %s1746_s18 = smov %s1373_s19 }
 0x1f7   : > { %s1747_s19 = smov %s1549_s3  ;;  %32 = sbr.rel (!%p30_p0) target bundleno = 18 (0x12), region = 149 }
 0x1fc   :  { %755 = vsyncpa [#allocation3], 1 }
 0x1fd   :  { %757 = vsyncpa [#allocation3 + $0x1], 1 }
 0x1fe   :  { %758 = vsyncpa [#allocation6], 1 }
 0x1ff   :  { %759 = vsyncpa [#allocation9], 1 }
 0x200   :  { %760 = vsyncpa [#allocation4], 1 }
 0x201   :  { %762 = vsyncpa [#allocation4 + $0x1], 1 }
 0x202   :  { %763 = vsyncpa [#allocation13], 1 }
 0x203   :  { %765 = vsyncpa [#allocation13 + $0x1], 1 }

// kernel: tpu_custom_call.1
= control target key start
LH: loop header
LB: loop body
LE: loop exit
PB: predicated region body
PF: predicated region fallthrough
CT: control target
= control target key end

     0   :  { %s1706_s0 = inlined_call_operand.hbm [shape: f32[2,8,32], index: 0, kind: input, shape index: {}]   ;;  %s1707_s1 = inlined_call_operand.hbm [shape: f32[1,32], index: 1, kind: input, shape index: {}]   ;;  %s1708_s2 = inlined_call_operand.vmem [shape: f32[1,32], index: 2, kind: input, shape index: {}]   ;;  %s1709_s3 = inlined_call_operand.hbm [shape: bf16[32,32], index: 3, kind: input, shape index: {}]   ;;  %s1710_s4 = inlined_call_operand.vmem [shape: f32[1,32], index: 4, kind: input, shape index: {}]   ;;  %s1711_s5 = inlined_call_operand.hbm [shape: bf16[32,32], index: 5, kind: input, shape index: {}]   ;;  %s1712_s6 = inlined_call_operand.vmem [shape: f32[1,32], index: 6, kind: input, shape index: {}]   ;;  %s1713_s7 = inlined_call_operand.hbm [shape: bf16[32,32], index: 7, kind: input, shape index: {}]   ;;  %s1714_s8 = inlined_call_operand.vmem [shape: f32[1,32], index: 8, kind: input, shape index: {}]   ;;  %s1715_s9 = inlined_call_operand.hbm [shape: bf16[2,8,32], index: 9, kind: output, shape index: {0}]   ;;  %s1716_s10 = inlined_call_operand.hbm [shape: bf16[2,8,32], index: 10, kind: output, shape index: {1}]   ;;  %s1717_s11 = inlined_call_operand.hbm [shape: bf16[2,8,32], index: 11, kind: output, shape index: {2}]  }
   0x1   :  { %1721 = sst [smem:[#allocation22_spill]] %s1706_s0 }
   0x2   :  { %1722 = sst [smem:[#allocation23_spill]] %s1707_s1 }
   0x3   :  { %1723 = sst [smem:[#allocation24_spill]] %s1708_s2 }
   0x4   :  { %1724 = sst [smem:[#allocation25_spill]] %s1709_s3 }
   0x5   :  { %1725 = sst [smem:[#allocation26_spill]] %s1710_s4 }
   0x6   :  { %1726 = sst [smem:[#allocation27_spill]] %s1711_s5 }
   0x7   :  { %1727 = sst [smem:[#allocation28_spill]] %s1713_s7 }
   0x8   :  { %17 = vsyncpa [#allocation3], 0 }
   0x9   :  { %19 = vsyncpa [#allocation3 + $0x1], 0 }
   0xa   :  { %20 = vsyncpa [#allocation6], 0 }
   0xb   :  { %21 = vsyncpa [#allocation9], 0 }
   0xc   :  { %22 = vsyncpa [#allocation4], 0 }
   0xd   :  { %24 = vsyncpa [#allocation4 + $0x1], 0 }
   0xe   :  { %25 = vsyncpa [#allocation13], 0 }
   0xf   :  { %27 = vsyncpa [#allocation13 + $0x1], 0  ;;  %s1454_s17 = smov 0   ;;  %s1456_s18 = smov 0  }
  0x10   :  { %s1458_s19 = smov 0   ;;  %s1460_s20 = smov 0  }
  0x11   :  { %s1462_s21 = smov 0   ;;  %s1464_s22 = smov 0  }
  0x12 LB: > { %1728 = sst [smem:[#allocation20_spill]] %s1381_s21  ;;  %s1485_s23 = sadd.s32 4294967295, %s1385_s22   ;;  %s1385_s22 = sphi %s1464_s22, %s33_s22   ;;  %s1381_s21 = sphi %s1462_s21, %s1744_s21   ;;  %s1377_s20 = sphi %s1460_s20, %s1743_s20   ;;  %s1373_s19 = sphi %s1458_s19, %s1747_s19   ;;  %s1369_s18 = sphi %s1456_s18, %s1746_s18   ;;  %s1365_s17 = sphi %s1454_s17, %s1745_s17  }
  0x13   : > { %p902_p0 = scmp.ge.s32.totalorder %s1385_s22, 1  ;;  %p68_p1 = scmp.eq.s32.totalorder %s1485_s23, 0 }
  0x14   : > { %p330_p2 = scmp.lt.s32.totalorder %s1385_s22, 3  ;;  %s1729_s1 = sld [smem:[#allocation23_spill]] }
  0x15   : > { %p907_p4 = scmp.ge.s32.totalorder %s1385_s22, 2  ;;  %s1387_s28 = smov [#allocation5]  }
  0x16   : > { %p1493_p3 = pnand %p902_p0, %p330_p2  ;;  %s344_s29 = sshll.u32 %s1387_s28, 4  ;;  %s345_s29 = int_to_ptr.vmem [resolvable:$true] %s344_s29 }
  0x17   : > { %s1732_s5 = sld [smem:[#allocation27_spill]]  ;;  %s1388_s15 = smov [#allocation8]  }
  0x18   : > { %p984_p5 = pneg %p1493_p3  ;;  %s375_s16 = sshll.u32 %s1388_s15, 4  ;;  %s376_s16 = int_to_ptr.vmem [resolvable:$true] %s375_s16 }
  0x19   : > { %s1733_s3 = sld [smem:[#allocation25_spill]]  ;;  %s1390_s12 = smov 4  }
  0x1a   : > { %s342_s26 = sshll.u32 %s1729_s1, 4  ;;  %p1502_p6 = pnand %p984_p5, %p68_p1  ;;  %s343_s26 = int_to_ptr.hbm [resolvable:$true] %s342_s26 }
  0x1b   : > { %s1389_s1 = smov 64   ;;  %s1734_s7 = sld [smem:[#allocation28_spill]] }
  0x1c   : > { %987 = dma.hbm_to_vmem [thread:$0]  (!%p1502_p6), %s343_s26, 16, %s345_s29, [#allocation6]  }
  0x1d   : > { %s373_s14 = sshll.u32 %s1732_s5, 4  ;;  %s1391_s15 = smov [#allocation7]   ;;  %s374_s14 = int_to_ptr.hbm [resolvable:$true] %s373_s14 }
  0x1e   : > { %993 = dma.hbm_to_vmem [thread:$0]  (!%p1502_p6), %s374_s14, 256, %s376_s16, [#allocation9], %s1389_s1, %s1389_s1, %s1390_s12  }
  0x1f   : > { %s356_s28 = sshll.u32 %s1733_s3, 4  ;;  %s358_s24 = sshll.u32 %s1391_s15, 4  ;;  %s357_s28 = int_to_ptr.hbm [resolvable:$true] %s356_s28  ;;  %s359_s24 = int_to_ptr.vmem [resolvable:$true] %s358_s24 }
  0x20   : > { %990 = dma.hbm_to_vmem [thread:$0]  (!%p1502_p6), %s357_s28, 256, %s359_s24, [#allocation6], %s1389_s1, %s1389_s1, %s1390_s12  }
  0x21   : > { %s390_s29 = sshll.u32 %s1734_s7, 4  ;;  %s1392_s25 = smov [#allocation10]   ;;  %s391_s29 = int_to_ptr.hbm [resolvable:$true] %s390_s29 }
  0x22   : > { %s392_s3 = sshll.u32 %s1392_s25, 4  ;;  %s45_s14 = sadd.s32 1, %s1381_s21  ;;  %s393_s3 = int_to_ptr.vmem [resolvable:$true] %s392_s3 }
  0x23   : > { %996 = dma.hbm_to_vmem [thread:$0]  (!%p1502_p6), %s391_s29, 256, %s393_s3, [#allocation9], %s1389_s1, %s1389_s1, %s1390_s12  }
  0x24   : > { %s1719_s16 = sadd.s32 4294967294, %s1385_s22   ;;  %p47_p7 = scmp.ge.s32.totalorder %s45_s14, 2 }
  0x25   : > { %s54_s13 = sadd.s32 1, %s1373_s19  ;;  %p61_p8 = scmp.ne.s32.totalorder %s1373_s19, %s1369_s18 }
  0x26   : > { %s1749_s14 = smov (%p47_p7, %s45_s14), 0  ;;  %p62_p9 = scmp.eq.s32.totalorder %s1385_s22, 0 }
  0x27   : > { %1735 = sst [smem:[#allocation21_spill]] %s1749_s14  ;;  %p67_p10 = scmp.ne.s32.totalorder %s1369_s18, %s1365_s17 }
  0x28   : > { %s49_s28 = ssub.s32 %s1381_s21, %s1749_s14  ;;  %p261_p11 = scmp.eq.s32.totalorder %s1485_s23, 1 }
  0x29   : > { %p52_p12 = scmp.eq.s32.totalorder %s49_s28, 0  ;;  %p1538_p13 = por %p68_p1, %p67_p10 }
  0x2a   : > { %p1542_p0 = por %p261_p11, %p61_p8  ;;  %p267_p2 = scmp.eq.s32.totalorder %s1719_s16, 1 }
  0x2b   : > { %s1549_s3 = scalar_select %p52_p12, %s1373_s19, %s54_s13  }
  0x2c   : > { %p63_p5 = por %p62_p9, %p61_p8  ;;  %p1551_p6 = por %p267_p2, %p67_p10 }
  0x2d   : > { %s409_s26 = sand.u32 1, %s1373_s19   ;;  %s909_s29 = sshll.u32 %s1381_s21, 3 }
  0x2e   : > { %p1015_p7 = scmp.lt.s32.totalorder %s1385_s22, 2  ;;  %s908_s15 = sshll.u32 %s409_s26, 3 }
  0x2f   : > { %s1739_s0 = sld [smem:[#allocation22_spill]]  ;;  %s413_s7 = scalar_lea.vmem [#allocation2], %s908_s15 }
  0x30   : > { %s422_s14 = sshll.u32 %s413_s7, 4  ;;  %p998_p11 = pnand %p1015_p7, %p63_p5  ;;  %s423_s14 = int_to_ptr.vmem [resolvable:$true] %s422_s14 }
  0x31   : > { %s410_s13 = scalar_lea.sflag [#allocation3], %s409_s26  ;;  %s1564_s16 = sand.u32 (!%p1493_p3), 1, %s1369_s18  }
  0x32   : > { %s911_s21 = sshll.u32 (!%p1493_p3), %s1564_s16, 3  ;;  %s434_s24 = scalar_lea.sflag (!%p1493_p3), [#allocation3], %s1564_s16 }
  0x33   : > { %431 = sbr.rel (%p1493_p3) target bundleno = 491 (0x1eb), region = 56 }
  0x35   : > { %s418_s28 = scalar_lea.hbm %s1739_s0, %s909_s29  ;;  %s437_s29 = scalar_lea.vmem (!%p1493_p3), [#allocation2], %s911_s21 }
  0x36   : > { %s420_s5 = sshll.u32 %s418_s28, 4  ;;  %s421_s5 = int_to_ptr.hbm [resolvable:$true] %s420_s5 }
  0x37   : > { %1000 = dma.hbm_to_vmem [thread:$0]  (!%p998_p11), %s421_s5, 128, %s423_s14, %s410_s13  }
  0x38   : > { %1344 = dma.done.wait (%p1538_p13), %s434_s24, 128  }
  0x39   : > { %1346 = vsyncadd (%p1538_p13), %s434_s24, 4294967168 }
  0x3a   : > { %1348 = dma.done.wait (%p68_p1), [#allocation6], 272  }
  0x3b   : > { %1350 = vsyncadd (%p68_p1), [#allocation6], 4294967024 }
  0x3c   : > { %1352 = dma.done.wait (%p68_p1), [#allocation9], 512  }
  0x3d   : > { %1354 = vsyncadd (%p68_p1), [#allocation9], 4294966784  ;;  %vm511_vm0 = vcmask 261120   ;;  %v508_v0 = vld [vmem:[%s437_s29] sm:$0xff]  ;;  %v1393_v2 = vmov 32.0   ;;  %v954_v17 = vld [vmem:[#allocation7] sm:$0xff] }
  0x3e   : > { %v512_v1 = vsel %vm511_vm0, %v508_v0, 0.0  ;;  %1081 = vrcp.f32 %v1393_v2  ;;  %v955_v14 = vld [vmem:[#allocation7 + $0x8] sm:$0xff]  ;;  %v957_v15 = vld [vmem:[#allocation8 + $0x8] sm:$0xff]  ;;  %v956_v18 = vld [vmem:[#allocation8] sm:$0xff]  ;;  %s1740_s2 = sld [smem:[#allocation24_spill]]  ;;  %s1589_s21 = sshll.u32 %s1564_s16, 2 }
  0x3f   : > { %513 = vadd.xlane.f32.xlu0 %v512_v1  ;;  %v959_v16 = vld [vmem:[#allocation10 + $0x8] sm:$0xff]  ;;  %579 = vmatpush.bf16.msra.mxu0 %v955_v14  ;;  %v958_v19 = vld [vmem:[#allocation10] sm:$0xff]  ;;  %v1076_v29 = vld [vmem:[#allocation5] ss:$0 sm:$0xff]  ;;  %s1592_s27 = sshll.u32 %s1377_s20, 2  ;;  %s1741_s4 = sld [smem:[#allocation26_spill]] }
  0x40   : > { %612 = vmatpush.bf16.msra.mxu1 %v957_v15  ;;  %645 = vmatpush.bf16.msra.mxu2 %v959_v16  ;;  %v1079_v37 = vld [vmem:[%s1712_s6] ss:$0 sm:$0xff]  ;;  %s697_s13 = scalar_lea.hbm %s1716_s10, %s1592_s27  ;;  %s665_s24 = sand.u32 1, %s1485_s23   ;;  %vm654_vm5 = vcmask 257024  }
  0x41   : > { %s499_s29 = scalar_lea.vmem [#allocation12], %s1589_s21  ;;  %s682_s14 = scalar_lea.hbm %s1715_s9, %s1592_s27  ;;  %v1080_v44 = vld [vmem:[%s1714_s8] ss:$0 sm:$0xff] }
  0x42   : > { %s1606_s5 = sshll.u32 %s499_s29, 4  ;;  %s1612_s30 = sshll.u32 %s697_s13, 4  ;;  %s700_s5 = int_to_ptr.vmem [resolvable:$true] %s1606_s5  ;;  %s702_s30 = int_to_ptr.hbm [resolvable:$true] %s1612_s30 }
  0x43   : > { %580 = vmatpush.bf16.msra.mxu0 %v954_v17  ;;  %s492_s26 = scalar_lea.vmem [#allocation11], %s1589_s21  ;;  %s1618_s15 = sshll.u32 %s682_s14, 4  ;;  %s687_s15 = int_to_ptr.hbm [resolvable:$true] %s1618_s15 }
  0x44   : > { %v1082_v3 = vpop.eup %1081  ;;  %613 = vmatpush.bf16.msra.mxu1 %v956_v18  ;;  %646 = vmatpush.bf16.msra.mxu2 %v958_v19  ;;  %v1077_v32 = vld [vmem:[%s1740_s2] ss:$0 sm:$0xff]  ;;  %s1616_s23 = sshll.u32 %s492_s26, 4  ;;  %s712_s7 = scalar_lea.hbm %s1717_s11, %s1592_s27  ;;  %s685_s23 = int_to_ptr.vmem [resolvable:$true] %s1616_s23 }
  0x45   : > { %v516_v4 = vmul.f32 32.0, %v1082_v3  ;;  %vm520_vm1 = vweird.f32 %v1082_v3  ;;  %v1078_v36 = vld [vmem:[%s1741_s4] ss:$0 sm:$0xff]  ;;  %s1631_s0 = scalar_lea.sflag [#allocation13], %s665_s24  ;;  %s1249_s14 = sshra.s32 %s702_s30, 4  ;;  %s1250_s14 = int_to_ptr.hbm [resolvable:$true] %s1249_s14 }
  0x46   : > { %s1251_s2 = scalar_lea.hbm %s1250_s14, 4  ;;  %s1255_s4 = scalar_lea.hbm %s1716_s10, 8 }
  0x47   : > { %v517_v5 = vsub.f32 1.0, %v516_v4  ;;  %p1252_p1 = scmp.ne.s32.totalorder %s1250_s14, %s1251_s2  ;;  %p1256_p9 = scmp.lt.s32.totalorder %s1250_s14, %s1716_s10 }
  0x48   : > { %p1257_p10 = scmp.lt.s32.totalorder %s1255_s4, %s1251_s2 }
  0x49   : > { %v518_v6 = vmul.f32 %v1082_v3, %v517_v5  ;;  %p1253_p3 = pnand %p1252_p1, %p1542_p0 }
  0x4a   : > { %p1258_p12 = por %p1257_p10, %p1256_p9 }
  0x4b   : > { %v519_v7 = vadd.f32 %v1082_v3, %v518_v6  ;;  %p1254_p8 = pneg %p1253_p3 }
  0x4d   : > { %v521_v8 = vsel %vm520_vm1, %v1082_v3, %v519_v7  ;;  %p1259_p13 = pnand %p1258_p12, %p1254_p8 }
  0xb2   : > { %v514_v9 = vpop.xlane.xlu0 %513 }
  0xb3   : > { %v522_v10 = vmul.f32 %v521_v8, %v514_v9 }
  0xb5   : > { %v523_v11 = vsub.f32 %v508_v0, %v522_v10 }
  0xb7   : > { %v524_v12 = vmul.f32 %v523_v11, %v523_v11 }
  0xb9   : > { %v525_v13 = vsel %vm511_vm0, %v524_v12, 0.0 }
  0xba   : > { %526 = vadd.xlane.f32.xlu0 %v525_v13 }
 0x12d   : > { %v527_v20 = vpop.xlane.xlu0 %526 }
 0x12e   : > { %v528_v21 = vmul.f32 %v527_v20, %v521_v8 }
 0x130   : > { %v529_v22 = vadd.f32 1e-05, %v528_v21 }
 0x132   : > { %1083 = vrsqrt.f32 %v529_v22  ;;  %vm536_vm3 = vweird.f32 %v529_v22 }
 0x138   : > { %v1084_v23 = vpop.eup %1083 }
 0x139   : > { %v531_v24 = vmul.f32 %v1084_v23, %v529_v22  ;;  %vm537_vm2 = vweird.f32 %v1084_v23 }
 0x13a   : > { %vm538_vm4 = vmor %vm536_vm3, %vm537_vm2 }
 0x13b   : > { %v532_v25 = vmul.f32 %v1084_v23, %v531_v24 }
 0x13d   : > { %v533_v26 = vmul.f32 0.5, %v532_v25 }
 0x13f   : > { %v534_v27 = vsub.f32 1.5, %v533_v26 }
 0x141   : > { %v535_v28 = vmul.f32 %v1084_v23, %v534_v27 }
 0x143   : > { %v539_v30 = vsel %vm538_vm4, %v1084_v23, %v535_v28 }
 0x144   : > { %v540_v31 = vmul.f32 %v539_v30, %v523_v11 }
 0x146   : > { %v544_v33 = vmul.f32 %v1076_v29, %v540_v31 }
 0x148   : > { %v548_v34 = vadd.f32 %v1077_v32, %v544_v33 }
 0x14a   : > { %v549_v35 = vpack.c.bf16 %v548_v34, %v548_v34 }
 0x14c   : > { %927 = vmatmul.msk.bf16.vlgmr.msra.gmra.mxu0 %vm511_vm0, %v549_v35  ;;  %936 = vmatmul.msk.bf16.vlgmr.msra.gmra.mxu1 %vm511_vm0, %v549_v35 }
 0x14d   : > { %945 = vmatmul.msk.bf16.vlgmr.msra.gmra.mxu2 %vm511_vm0, %v549_v35 }
 0x1c9   : > { %v582_v38 = vpop.f32.mrf.mxu0  ;;  %v615_v39 = vpop.f32.mrf.mxu1 }
 0x1ca   : > { %v583_v40 = vadd.f32 %v1078_v36, %v582_v38  ;;  %v616_v41 = vadd.f32 %v1079_v37, %v615_v39 }
 0x1cc   : > { %v652_v42 = vmul.f32 0.35355338, %v583_v40  ;;  %v656_v43 = vpack.c.bf16 %v616_v41, %v616_v41 }
 0x1ce   : > { %v653_v45 = vpack.c.bf16 %v652_v42, %v652_v42  ;;  %657 = vst.msk [vmem:[%s499_s29] sm:$0xf] %vm654_vm5, %v656_v43 }
 0x1cf   : > { %1262 = shalt.err (!%p1259_p13)
}
 0x1d0   : > { %979 = dma.vmem_to_hbm [thread:$0]  (%p1542_p0), %s700_s5, 64, %s702_s30, %s1631_s0   ;;  %v648_v46 = vpop.f32.mrf.mxu2  ;;  %655 = vst.msk [vmem:[%s492_s26] sm:$0xf] %vm654_vm5, %v653_v45 }
 0x1d1   : > { %s506_s24 = scalar_lea.vmem [#allocation14], %s1589_s21  ;;  %s1648_s20 = sshll.u32 %s712_s7, 4  ;;  %v649_v47 = vadd.f32 %v1080_v44, %v648_v46  ;;  %v584_v48 = vpop.f32.mrf.mxu0  ;;  %v617_v49 = vpop.f32.mrf.mxu1  ;;  %s717_s20 = int_to_ptr.hbm [resolvable:$true] %s1648_s20 }
 0x1d2   : > { %s1646_s29 = sshll.u32 %s506_s24, 4  ;;  %s661_s2 = scalar_lea.sflag [#allocation4], %s1564_s16  ;;  %s715_s29 = int_to_ptr.vmem [resolvable:$true] %s1646_s29 }
 0x1d3   : > { %s1277_s4 = sshra.s32 %s687_s15, 4  ;;  %s1283_s21 = scalar_lea.hbm %s1715_s9, 8  ;;  %s1278_s4 = int_to_ptr.hbm [resolvable:$true] %s1277_s4 }
 0x1d4   : > { %s1279_s14 = scalar_lea.hbm %s1278_s4, 4  ;;  %p1284_p11 = scmp.lt.s32.totalorder %s1278_s4, %s1715_s9 }
 0x1d5   : > { %p1280_p2 = scmp.ne.s32.totalorder %s1278_s4, %s1279_s14  ;;  %p1285_p1 = scmp.lt.s32.totalorder %s1283_s21, %s1279_s14 }
 0x1d7   : > { %p1281_p5 = pnand %p1280_p2, %p1542_p0  ;;  %p1286_p3 = por %p1285_p1, %p1284_p11 }
 0x1d9   : > { %p1282_p7 = pneg %p1281_p5 }
 0x1db   : > { %p1287_p8 = pnand %p1286_p3, %p1282_p7 }
 0x1dd   : > { %1290 = shalt.err (!%p1287_p8)
}
 0x1de   : > { %978 = dma.vmem_to_hbm [thread:$0]  (%p1542_p0), %s685_s23, 64, %s687_s15, %s661_s2   ;;  %v658_v50 = vpack.c.bf16 %v649_v47, %v649_v47 }
 0x1df   : > { %s1305_s16 = sshra.s32 %s717_s20, 4  ;;  %s1311_s27 = scalar_lea.hbm %s1717_s11, 8  ;;  %s1306_s16 = int_to_ptr.hbm [resolvable:$true] %s1305_s16 }
 0x1e0   : > { %659 = vst.msk [vmem:[%s506_s24] sm:$0xf] %vm654_vm5, %v658_v50  ;;  %s1307_s7 = scalar_lea.hbm %s1306_s16, 4  ;;  %p1312_p13 = scmp.lt.s32.totalorder %s1306_s16, %s1717_s11 }
 0x1e1   : > { %p1308_p9 = scmp.ne.s32.totalorder %s1306_s16, %s1307_s7  ;;  %p1313_p2 = scmp.lt.s32.totalorder %s1311_s27, %s1307_s7 }
 0x1e3   : > { %p1309_p10 = pnand %p1308_p9, %p1542_p0  ;;  %p1314_p5 = por %p1313_p2, %p1312_p13 }
 0x1e5   : > { %p1310_p12 = pneg %p1309_p10 }
 0x1e7   : > { %p1315_p7 = pnand %p1314_p5, %p1310_p12 }
 0x1e9   : > { %1318 = shalt.err (!%p1315_p7)
}
 0x1ea   : > { %980 = dma.vmem_to_hbm [thread:$0]  (%p1542_p0), %s715_s29, 64, %s717_s20, %s1631_s0   ;;  %v650_v51 = vpop.f32.mrf.mxu2 }
 0x1eb PF: > { %s728_s23 = sand.u32 1, %s1365_s17   ;;  %p1002_p11 = pnand %p907_p4, %p1551_p6 }
 0x1ec   : > { %s729_s15 = scalar_lea.sflag [#allocation4], %s728_s23 }
 0x1ed   : > { %p1003_p1 = pneg %p1002_p11 }
 0x1ef   : > { %1356 = dma.done.wait (%p1003_p1), %s729_s15, 64  }
 0x1f0   : > { %1358 = vsyncadd (%p1003_p1), %s729_s15, 4294967232  ;;  %s1742_s24 = sadd.s32 4294967294, %s1385_s22  }
 0x1f1   : > { %s738_s2 = sand.u32 1, %s1742_s24  }
 0x1f2   : > { %s739_s5 = scalar_lea.sflag [#allocation13], %s738_s2 }
 0x1f3   : > { %1360 = dma.done.wait (%p1003_p1), %s739_s5, 128  }
 0x1f4   : > { %1362 = vsyncadd (%p1003_p1), %s739_s5, 4294967168  ;;  %s33_s22 = sadd.s32 1, %s1385_s22   ;;  %s1743_s20 = sld [smem:[#allocation20_spill]] }
 0x1f5   : > { %p30_p0 = scmp.ge.s32.totalorder %s33_s22, 4   ;;  %s1744_s21 = sld [smem:[#allocation21_spill]] }
 0x1f6   : > { %s1745_s17 = smov %s1369_s18  ;;  %s1746_s18 = smov %s1373_s19 }
 0x1f7   : > { %s1747_s19 = smov %s1549_s3  ;;  %32 = sbr.rel (!%p30_p0) target bundleno = 18 (0x12), region = 149 }
 0x1fc   :  { %755 = vsyncpa [#allocation3], 1 }
 0x1fd   :  { %757 = vsyncpa [#allocation3 + $0x1], 1 }
 0x1fe   :  { %758 = vsyncpa [#allocation6], 1 }
 0x1ff   :  { %759 = vsyncpa [#allocation9], 1 }
 0x200   :  { %760 = vsyncpa [#allocation4], 1 }
 0x201   :  { %762 = vsyncpa [#allocation4 + $0x1], 1 }
 0x202   :  { %763 = vsyncpa [#allocation13], 1 }
 0x203   :  { %765 = vsyncpa [#allocation13 + $0x1], 1 }

</bundles_post_ra>
